<compile_context>
chip_gen: v7x
topology: tpu7x:2x2x1
jax: 0.10.0
libtpu: 0.0.40
codegen_flags: <defaults>
</compile_context>

<pallas_src>
import functools

import jax
import jax.numpy as jnp
from jax.experimental import pallas as pl
from jax.experimental.pallas import tpu as pltpu

ACTION_SIZE = 20
HIDDEN_SIZE = 128
STATE_SIZE = 26
HEAD_PAD = 128          # lane-dense fused-head width (>= 2 * ACTION_SIZE)
DEFAULT_TB = 512        # batch tile; amortizes per-step overhead at real B


def _round_up(n, m):
    return ((n + m - 1) // m) * m


def actor_kernel(x_ref,
                 w1_ref, b1_ref,
                 w2_ref, b2_ref,
                 wh_ref, bh_ref,
                 out_ref):
    x = x_ref[...]                                            # (TB, 26) f32

    h1 = jnp.dot(x, w1_ref[...], preferred_element_type=jnp.float32) + b1_ref[...]
    h1 = jnp.maximum(h1, 0.0)                                 # (TB, 128)

    h2 = jnp.dot(h1, w2_ref[...], preferred_element_type=jnp.float32) + b2_ref[...]
    h2 = jnp.maximum(h2, 0.0)                                 # (TB, 128)

    # Fused mu||std head, zero-padded to 128 lanes -> single MXU pass.
    head = jnp.dot(h2, wh_ref[...], preferred_element_type=jnp.float32) + bh_ref[...]

    # Per-column-range activations; padded lanes are forced to 0 so they can
    # never leak into the sliced mu/std outputs.
    col = jax.lax.broadcasted_iota(jnp.int32, head.shape, 1)
    mu_vals = jnp.clip(head, -5.0, 5.0)
    std_vals = jnp.exp(jnp.tanh(head))
    out_ref[...] = jnp.where(
        col < ACTION_SIZE, mu_vals,
        jnp.where(col < 2 * ACTION_SIZE, std_vals, 0.0))


def fuse_params(params):
    """(w1,b1,w2,b2,wmu,bmu,wstd,bstd) -> kernel params with fused, padded head."""
    w1, b1, w2, b2, wmu, bmu, wstd, bstd = params
    wh = jnp.concatenate([wmu, wstd], axis=1)                 # (128, 40)
    bh = jnp.concatenate([bmu, bstd], axis=1)                 # (1, 40)
    wh = jnp.pad(wh, ((0, 0), (0, HEAD_PAD - 2 * ACTION_SIZE)))
    bh = jnp.pad(bh, ((0, 0), (0, HEAD_PAD - 2 * ACTION_SIZE)))
    return (w1, b1, w2, b2, wh, bh)


@functools.partial(jax.jit, static_argnames=("tb",))
def actor_forward(x, kernel_params, *, tb=DEFAULT_TB):
    """x: (B, STATE_SIZE) f32. kernel_params from fuse_params().
    Returns (mu, std), each (B, ACTION_SIZE) f32."""
    B = x.shape[0]
    w1, b1, w2, b2, wh, bh = kernel_params

    # Batch tile: multiple of 8 (sublanes); pad B up so the grid divides evenly.
    tile_b = min(tb, _round_up(B, 8))
    b_pad = _round_up(B, tile_b)
    if b_pad != B:
        x = jnp.pad(x, ((0, b_pad - B), (0, 0)))
    grid = (b_pad // tile_b,)

    def resident(arr):
        # Constant block index -> weight/bias stays VMEM-resident across steps.
        nd = arr.ndim
        return pl.BlockSpec(arr.shape, lambda i, _nd=nd: (0,) * _nd)

    out = pl.pallas_call(
        actor_kernel,
        out_shape=jax.ShapeDtypeStruct((b_pad, HEAD_PAD), jnp.float32),
        grid=grid,
        in_specs=[
            pl.BlockSpec((tile_b, STATE_SIZE), lambda i: (i, 0)),   # x tile
            resident(w1), resident(b1),
            resident(w2), resident(b2),
            resident(wh), resident(bh),
        ],
        out_specs=pl.BlockSpec((tile_b, HEAD_PAD), lambda i: (i, 0)),
        compiler_params=pltpu.CompilerParams(
            dimension_semantics=("parallel",),        # shards batch across TCs on v7x
            vmem_limit_bytes=32 * 1024 * 1024,        # safe on v5e/v6e/v7x
        ),
    )(x, w1, b1, w2, b2, wh, bh)

    mu = out[:B, :ACTION_SIZE]
    std = out[:B, ACTION_SIZE:2 * ACTION_SIZE]
    return mu, std


def init_params(key):
    """Deterministic init mimicking PyTorch nn.Linear default (U[-1/sqrt(fan_in), +]).
    Weights stored (in_features, out_features) so y = x @ W + b."""
    def linear(key, fan_in, fan_out):
        kw, kb = jax.random.split(key)
        bound = 1.0 / jnp.sqrt(fan_in)
        w = jax.random.uniform(kw, (fan_in, fan_out), jnp.float32, -bound, bound)
        b = jax.random.uniform(kb, (1, fan_out), jnp.float32, -bound, bound)
        return w, b

    k1, k2, k3, k4 = jax.random.split(key, 4)
    w1, b1 = linear(k1, STATE_SIZE, HIDDEN_SIZE)
    w2, b2 = linear(k2, HIDDEN_SIZE, HIDDEN_SIZE)
    wmu, bmu = linear(k3, HIDDEN_SIZE, ACTION_SIZE)
    wstd, bstd = linear(k4, HIDDEN_SIZE, ACTION_SIZE)
    return (w1, b1, w2, b2, wmu, bmu, wstd, bstd)


def _reference_forward(x, params):
    w1, b1, w2, b2, wmu, bmu, wstd, bstd = params
    h1 = jnp.maximum(x @ w1 + b1, 0.0)
    h2 = jnp.maximum(h1 @ w2 + b2, 0.0)
    mu = jnp.clip(h2 @ wmu + bmu, -5.0, 5.0)
    std = jnp.exp(jnp.tanh(h2 @ wstd + bstd))
    return mu, std


if __name__ == "__main__":
    key = jax.random.PRNGKey(0)
    kx1, kx2, kp = jax.random.split(key, 3)

    params = init_params(kp)
    kparams = fuse_params(params)

    # Small inference-style batch (single grid step).
    B1 = 8
    x1 = jax.random.normal(kx1, (B1, STATE_SIZE), jnp.float32)
    mu1, std1 = actor_forward(x1, kparams)
    jax.block_until_ready((mu1, std1))
    mu1_ref, std1_ref = _reference_forward(x1, params)
    assert mu1.shape == (B1, ACTION_SIZE) and std1.shape == (B1, ACTION_SIZE)
    assert jnp.allclose(mu1, mu1_ref, atol=1e-5, rtol=1e-5)
    assert jnp.allclose(std1, std1_ref, atol=1e-5, rtol=1e-5)

    # Ragged batch with a small tile to exercise the batch grid + padding path.
    B2 = 40
    x2 = jax.random.normal(kx2, (B2, STATE_SIZE), jnp.float32)
    mu2, std2 = actor_forward(x2, kparams, tb=16)   # grid = 3 steps
    jax.block_until_ready((mu2, std2))
    mu2_ref, std2_ref = _reference_forward(x2, params)
    assert mu2.shape == (B2, ACTION_SIZE) and std2.shape == (B2, ACTION_SIZE)
    assert jnp.allclose(mu2, mu2_ref, atol=1e-5, rtol=1e-5)
    assert jnp.allclose(std2, std2_ref, atol=1e-5, rtol=1e-5)

    print("KERNEL_OK")
</pallas_src>

<mosaic_0001>
module attributes {stable_mosaic.version = 11 : i64} {
  func.func @actor_kernel(%arg0: i32, %arg1: memref<8x26xf32, #tpu.memory_space<vmem>>, %arg2: memref<26x128xf32, #tpu.memory_space<vmem>>, %arg3: memref<1x128xf32, #tpu.memory_space<vmem>>, %arg4: memref<128x128xf32, #tpu.memory_space<vmem>>, %arg5: memref<1x128xf32, #tpu.memory_space<vmem>>, %arg6: memref<128x128xf32, #tpu.memory_space<vmem>>, %arg7: memref<1x128xf32, #tpu.memory_space<vmem>>, %arg8: memref<8x128xf32, #tpu.memory_space<vmem>>) attributes {dimension_semantics = [#tpu.dimension_semantics<parallel>], iteration_bounds = array<i64: 1>, scalar_prefetch = 0 : i64, scratch_operands = 0 : i64, tpu.core_type = #tpu.core_type<tc>, window_params = [{transform_indices = @transform_0, window_bounds = array<i64: 8, 26>}, {pipeline_mode = #tpu.pipeline_mode<synchronous>, transform_indices = @transform_1, window_bounds = array<i64: 26, 128>}, {pipeline_mode = #tpu.pipeline_mode<synchronous>, transform_indices = @transform_2, window_bounds = array<i64: 1, 128>}, {pipeline_mode = #tpu.pipeline_mode<synchronous>, transform_indices = @transform_3, window_bounds = array<i64: 128, 128>}, {pipeline_mode = #tpu.pipeline_mode<synchronous>, transform_indices = @transform_4, window_bounds = array<i64: 1, 128>}, {pipeline_mode = #tpu.pipeline_mode<synchronous>, transform_indices = @transform_5, window_bounds = array<i64: 128, 128>}, {pipeline_mode = #tpu.pipeline_mode<synchronous>, transform_indices = @transform_6, window_bounds = array<i64: 1, 128>}, {transform_indices = @transform_7, window_bounds = array<i64: 8, 128>}]} {
    %c0 = arith.constant 0 : index
    %c0_0 = arith.constant 0 : index
    %0 = vector.load %arg1[%c0, %c0_0] : memref<8x26xf32, #tpu.memory_space<vmem>>, vector<8x26xf32>
    %c0_1 = arith.constant 0 : index
    %c0_2 = arith.constant 0 : index
    %1 = vector.load %arg2[%c0_1, %c0_2] : memref<26x128xf32, #tpu.memory_space<vmem>>, vector<26x128xf32>
    %cst = arith.constant dense<0.000000e+00> : vector<8x128xf32>
    %2 = tpu.matmul %0, %1, %cst {dimension_numbers = #tpu.dot_dimension_numbers<[1], [0], [0], [1], [0, 0, 1, 1], [], []>} : vector<8x26xf32>, vector<26x128xf32>, vector<8x128xf32> -> vector<8x128xf32>
    %c0_3 = arith.constant 0 : index
    %c0_4 = arith.constant 0 : index
    %3 = vector.load %arg3[%c0_3, %c0_4] : memref<1x128xf32, #tpu.memory_space<vmem>>, vector<1x128xf32>
    %4 = vector.broadcast %3 : vector<1x128xf32> to vector<8x128xf32>
    %5 = arith.addf %2, %4 : vector<8x128xf32>
    %cst_5 = arith.constant 0.000000e+00 : f32
    %6 = vector.broadcast %cst_5 : f32 to vector<8x128xf32>
    %7 = arith.maximumf %5, %6 : vector<8x128xf32>
    %c0_6 = arith.constant 0 : index
    %c0_7 = arith.constant 0 : index
    %8 = vector.load %arg4[%c0_6, %c0_7] : memref<128x128xf32, #tpu.memory_space<vmem>>, vector<128x128xf32>
    %cst_8 = arith.constant dense<0.000000e+00> : vector<8x128xf32>
    %9 = tpu.matmul %7, %8, %cst_8 {dimension_numbers = #tpu.dot_dimension_numbers<[1], [0], [0], [1], [0, 0, 1, 1], [], []>} : vector<8x128xf32>, vector<128x128xf32>, vector<8x128xf32> -> vector<8x128xf32>
    %c0_9 = arith.constant 0 : index
    %c0_10 = arith.constant 0 : index
    %10 = vector.load %arg5[%c0_9, %c0_10] : memref<1x128xf32, #tpu.memory_space<vmem>>, vector<1x128xf32>
    %11 = vector.broadcast %10 : vector<1x128xf32> to vector<8x128xf32>
    %12 = arith.addf %9, %11 : vector<8x128xf32>
    %cst_11 = arith.constant 0.000000e+00 : f32
    %13 = vector.broadcast %cst_11 : f32 to vector<8x128xf32>
    %14 = arith.maximumf %12, %13 : vector<8x128xf32>
    %c0_12 = arith.constant 0 : index
    %c0_13 = arith.constant 0 : index
    %15 = vector.load %arg6[%c0_12, %c0_13] : memref<128x128xf32, #tpu.memory_space<vmem>>, vector<128x128xf32>
    %cst_14 = arith.constant dense<0.000000e+00> : vector<8x128xf32>
    %16 = tpu.matmul %14, %15, %cst_14 {dimension_numbers = #tpu.dot_dimension_numbers<[1], [0], [0], [1], [0, 0, 1, 1], [], []>} : vector<8x128xf32>, vector<128x128xf32>, vector<8x128xf32> -> vector<8x128xf32>
    %c0_15 = arith.constant 0 : index
    %c0_16 = arith.constant 0 : index
    %17 = vector.load %arg7[%c0_15, %c0_16] : memref<1x128xf32, #tpu.memory_space<vmem>>, vector<1x128xf32>
    %18 = vector.broadcast %17 : vector<1x128xf32> to vector<8x128xf32>
    %19 = arith.addf %16, %18 : vector<8x128xf32>
    %20 = tpu.iota {dimensions = array<i32: 1>} : vector<8x128xi32>
    %cst_17 = arith.constant -5.000000e+00 : f32
    %cst_18 = arith.constant 5.000000e+00 : f32
    %21 = vector.broadcast %cst_17 : f32 to vector<8x128xf32>
    %22 = arith.maximumf %21, %19 : vector<8x128xf32>
    %23 = vector.broadcast %cst_18 : f32 to vector<8x128xf32>
    %24 = arith.minimumf %23, %22 : vector<8x128xf32>
    %25 = math.tanh %19 : vector<8x128xf32>
    %26 = math.exp %25 : vector<8x128xf32>
    %c20_i32 = arith.constant 20 : i32
    %27 = vector.broadcast %c20_i32 : i32 to vector<8x128xi32>
    %28 = arith.cmpi slt, %20, %27 : vector<8x128xi32>
    %c40_i32 = arith.constant 40 : i32
    %29 = vector.broadcast %c40_i32 : i32 to vector<8x128xi32>
    %30 = arith.cmpi slt, %20, %29 : vector<8x128xi32>
    %cst_19 = arith.constant 0.000000e+00 : f32
    %31 = vector.broadcast %cst_19 : f32 to vector<8x128xf32>
    %32 = arith.select %30, %26, %31 : vector<8x128xi1>, vector<8x128xf32>
    %33 = arith.select %28, %24, %32 : vector<8x128xi1>, vector<8x128xf32>
    %c0_20 = arith.constant 0 : index
    %c0_21 = arith.constant 0 : index
    %34 = vector.load %arg8[%c0_20, %c0_21] : memref<8x128xf32, #tpu.memory_space<vmem>>, vector<8x128xf32>
    tpu.vector_store %arg8[%c0_20, %c0_21], %33 {strides = array<i32>} : memref<8x128xf32, #tpu.memory_space<vmem>>, vector<8x128xf32>,
    return
  }
  func.func @transform_0(%arg0: i32) -> (i32, i32) {
    %c0_i32 = arith.constant 0 : i32
    %c0_i32_0 = arith.constant 0 : i32
    return %arg0, %c0_i32 : i32, i32
  }
  func.func @transform_1(%arg0: i32) -> (i32, i32) {
    %c0_i32 = arith.constant 0 : i32
    %c0_i32_0 = arith.constant 0 : i32
    %c0_i32_1 = arith.constant 0 : i32
    return %c0_i32, %c0_i32_0 : i32, i32
  }
  func.func @transform_2(%arg0: i32) -> (i32, i32) {
    %c0_i32 = arith.constant 0 : i32
    %c0_i32_0 = arith.constant 0 : i32
    %c0_i32_1 = arith.constant 0 : i32
    return %c0_i32, %c0_i32_0 : i32, i32
  }
  func.func @transform_3(%arg0: i32) -> (i32, i32) {
    %c0_i32 = arith.constant 0 : i32
    %c0_i32_0 = arith.constant 0 : i32
    %c0_i32_1 = arith.constant 0 : i32
    return %c0_i32, %c0_i32_0 : i32, i32
  }
  func.func @transform_4(%arg0: i32) -> (i32, i32) {
    %c0_i32 = arith.constant 0 : i32
    %c0_i32_0 = arith.constant 0 : i32
    %c0_i32_1 = arith.constant 0 : i32
    return %c0_i32, %c0_i32_0 : i32, i32
  }
  func.func @transform_5(%arg0: i32) -> (i32, i32) {
    %c0_i32 = arith.constant 0 : i32
    %c0_i32_0 = arith.constant 0 : i32
    %c0_i32_1 = arith.constant 0 : i32
    return %c0_i32, %c0_i32_0 : i32, i32
  }
  func.func @transform_6(%arg0: i32) -> (i32, i32) {
    %c0_i32 = arith.constant 0 : i32
    %c0_i32_0 = arith.constant 0 : i32
    %c0_i32_1 = arith.constant 0 : i32
    return %c0_i32, %c0_i32_0 : i32, i32
  }
  func.func @transform_7(%arg0: i32) -> (i32, i32) {
    %c0_i32 = arith.constant 0 : i32
    %c0_i32_0 = arith.constant 0 : i32
    return %arg0, %c0_i32 : i32, i32
  }
}

</mosaic_0001>

<bundles_post_ra>
// kernel: actor_forward.1
= control target key start
LH: loop header
LB: loop body
LE: loop exit
PB: predicated region body
PF: predicated region fallthrough
CT: control target
= control target key end

     0   :  { %12 = vsyncpa [#allocation3], 0  ;;  %s805_s0 = inlined_call_operand.hbm [shape: f32[8,26], index: 0, kind: input, shape index: {}]   ;;  %s806_s1 = inlined_call_operand.hbm [shape: f32[26,128], index: 1, kind: input, shape index: {}]   ;;  %s807_s2 = inlined_call_operand.vmem [shape: f32[1,128], index: 2, kind: input, shape index: {}]   ;;  %s808_s3 = inlined_call_operand.hbm [shape: f32[128,128], index: 3, kind: input, shape index: {}]   ;;  %s809_s4 = inlined_call_operand.vmem [shape: f32[1,128], index: 4, kind: input, shape index: {}]   ;;  %s810_s5 = inlined_call_operand.hbm [shape: f32[128,128], index: 5, kind: input, shape index: {}]   ;;  %s811_s6 = inlined_call_operand.vmem [shape: f32[1,128], index: 6, kind: input, shape index: {}]   ;;  %s812_s7 = inlined_call_operand.vmem [shape: f32[8,128], index: 7, kind: output, shape index: {}]  }
   0x1   :  { %13 = vsyncpa [#allocation5], 0 }
   0x2   :  { %14 = vsyncpa [#allocation8], 0  ;;  %s665_s24 = smov [#allocation4]   ;;  %s571_s28 = scalar_lea.hbm %s806_s1, 512 }
   0x3   :  { %s30_s25 = sshll.u32 %s665_s24, 4  ;;  %p572_p0 = scmp.ne.s32.totalorder %s806_s1, %s571_s28  ;;  %s31_s25 = int_to_ptr.vmem [resolvable:$true] %s30_s25 }
   0x4   :  { %p575_p1 = scmp.lt.u32.totalorder %s571_s28, %s806_s1 }
   0x6   :  { %p577_p2 = pnand %p575_p1, %p572_p0 }
   0x8   :  { %580 = shalt.err (!%p577_p2)
}
   0x9   :  { %s581_s10 = scalar_lea.vmem %s31_s25, 512  ;;  %p586_p4 = scmp.lt.s32.totalorder %s31_s25, %s31_s25 }
   0xa   :  { %p582_p3 = scmp.ne.s32.totalorder %s31_s25, %s581_s10  ;;  %p587_p5 = scmp.lt.s32.totalorder %s581_s10, %s581_s10 }
   0xc   :  { %p588_p6 = por %p587_p5, %p586_p4 }
   0xe   :  { %p589_p7 = pnand %p588_p6, %p582_p3 }
  0x10   :  { %592 = shalt.err (!%p589_p7)
}
  0x11   :  { %s666_s11 = smov 128   ;;  %s667_s12 = smov 8  }
  0x12   :  { %36 = dma.hbm_to_vmem [thread:$0]  %s806_s1, 512, %s31_s25, [#allocation5], %s666_s11, %s666_s11, %s667_s12  }
  0x13   :  { %s668_s15 = smov [#allocation2]   ;;  %s669_s17 = smov [#allocation6]  }
  0x14   :  { %s21_s16 = sshll.u32 %s668_s15, 4  ;;  %s44_s18 = sshll.u32 %s669_s17, 4  ;;  %s22_s16 = int_to_ptr.vmem [resolvable:$true] %s21_s16  ;;  %s45_s18 = int_to_ptr.vmem [resolvable:$true] %s44_s18 }
  0x15   :  { %s593_s21 = scalar_lea.hbm %s805_s0, 128 }
  0x16   :  { %p594_p8 = scmp.ne.s32.totalorder %s805_s0, %s593_s21  ;;  %p597_p9 = scmp.lt.u32.totalorder %s593_s21, %s805_s0 }
  0x18   :  { %p599_p10 = pnand %p597_p9, %p594_p8 }
  0x1a   :  { %602 = shalt.err (!%p599_p10)
}
  0x1b   :  { %s603_s1 = scalar_lea.vmem %s22_s16, 128  ;;  %p608_p12 = scmp.lt.s32.totalorder %s22_s16, %s22_s16 }
  0x1c   :  { %p604_p11 = scmp.ne.s32.totalorder %s22_s16, %s603_s1  ;;  %p609_p13 = scmp.lt.s32.totalorder %s603_s1, %s603_s1 }
  0x1e   :  { %p610_p0 = por %p609_p13, %p608_p12 }
  0x20   :  { %p611_p1 = pnand %p610_p0, %p604_p11 }
  0x22   :  { %614 = shalt.err (!%p611_p1)
}
  0x23   :  { %24 = dma.hbm_to_vmem [thread:$0]  %s805_s0, 128, %s22_s16, [#allocation3]  }
  0x24   :  { %s615_s30 = scalar_lea.hbm %s808_s3, 2048 }
  0x25   :  { %p616_p2 = scmp.ne.s32.totalorder %s808_s3, %s615_s30  ;;  %p619_p3 = scmp.lt.u32.totalorder %s615_s30, %s808_s3 }
  0x27   :  { %p621_p4 = pnand %p619_p3, %p616_p2 }
  0x29   :  { %624 = shalt.err (!%p621_p4)
}
  0x2a   :  { %s625_s14 = scalar_lea.vmem %s45_s18, 2048  ;;  %p630_p6 = scmp.lt.s32.totalorder %s45_s18, %s45_s18 }
  0x2b   :  { %p626_p5 = scmp.ne.s32.totalorder %s45_s18, %s625_s14  ;;  %p631_p7 = scmp.lt.s32.totalorder %s625_s14, %s625_s14 }
  0x2d   :  { %p632_p8 = por %p631_p7, %p630_p6 }
  0x2f   :  { %p633_p9 = pnand %p632_p8, %p626_p5 }
  0x31   :  { %636 = shalt.err (!%p633_p9)
}
  0x32   :  { %50 = dma.hbm_to_vmem [thread:$0]  %s808_s3, 2048, %s45_s18, [#allocation5], %s666_s11, %s666_s11, %s667_s12  }
  0x33   :  { %s670_s16 = smov [#allocation7]   ;;  %s637_s21 = scalar_lea.hbm %s810_s5, 2048 }
  0x34   :  { %s58_s17 = sshll.u32 %s670_s16, 4  ;;  %p638_p10 = scmp.ne.s32.totalorder %s810_s5, %s637_s21  ;;  %s59_s17 = int_to_ptr.vmem [resolvable:$true] %s58_s17 }
  0x35   :  { %p641_p11 = scmp.lt.u32.totalorder %s637_s21, %s810_s5 }
  0x37   :  { %p643_p12 = pnand %p641_p11, %p638_p10 }
  0x39   :  { %646 = shalt.err (!%p643_p12)
}
  0x3a   :  { %s647_s1 = scalar_lea.vmem %s59_s17, 2048  ;;  %p652_p0 = scmp.lt.s32.totalorder %s59_s17, %s59_s17 }
  0x3b   :  { %p648_p13 = scmp.ne.s32.totalorder %s59_s17, %s647_s1  ;;  %p653_p1 = scmp.lt.s32.totalorder %s647_s1, %s647_s1 }
  0x3d   :  { %p654_p2 = por %p653_p1, %p652_p0 }
  0x3f   :  { %p655_p3 = pnand %p654_p2, %p648_p13 }
  0x41   :  { %658 = shalt.err (!%p655_p3)
}
  0x42   :  { %64 = dma.hbm_to_vmem [thread:$0]  %s810_s5, 2048, %s59_s17, [#allocation8], %s666_s11, %s666_s11, %s667_s12  }
  0x43   :  { %659 = dma.done.wait [#allocation3], 128  }
  0x44   :  { %660 = vsyncadd [#allocation3], 4294967168 }
  0x45   :  { %661 = dma.done.wait [#allocation5], 2560  }
  0x46   :  { %662 = vsyncadd [#allocation5], 4294964736 }
  0x47   :  { %663 = dma.done.wait [#allocation8], 2048  }
  0x48   :  { %664 = vsyncadd [#allocation8], 4294965248  ;;  %v671_v0 = vmov 0.0|0.0   ;;  %vm672_vm0 = vmmov 0   ;;  %v673_v1 = vmov 0.0   ;;  %v80_v2 = vld [vmem:[#allocation4] sm:$0xff] }
  0x49   :  { %502 = vmatprep.subr.bf16.mxu0 %v671_v0  ;;  %509 = vmatprep.subr.bf16.mxu1 %v671_v0  ;;  %v81_v3 = vld [vmem:[#allocation4 + $0x8] sm:$0xff]  ;;  %v82_v4 = vld [vmem:[#allocation4 + $0x10] sm:$0xff]  ;;  %v83_v6 = vld [vmem:[#allocation4 + $0x18] sm:$0x3]  ;;  %vm95_vm1 = vcmask 1041408   ;;  %vm674_vm2 = vmmov 1  }
  0x4a   :  { %429 = vmatprep.mubr.msk.f32.mxu0 %vm672_vm0, %v673_v1  ;;  %464 = vmatprep.mubr.msk.f32.mxu1 %vm672_vm0, %v673_v1  ;;  %v503_v5 = vpack.c.bf16 %v81_v3, %v80_v2  ;;  %v170_v7 = vld [vmem:[#allocation6] sm:$0xff]  ;;  %v171_v8 = vld [vmem:[#allocation6 + $0x8] sm:$0xff]  ;;  %v172_v9 = vld [vmem:[#allocation6 + $0x10] sm:$0xff]  ;;  %v506_v11 = vpack.c.bf16 %v83_v6, %v82_v4  ;;  %vm91_vm4 = vcmask 211968  }
  0x4b   :  { %v173_v10 = vld [vmem:[#allocation6 + $0x18] sm:$0xff]  ;;  %v510_v12 = vpack.c.bf16 %v171_v8, %v170_v7  ;;  %vm507_vm3 = vmpackc.low %vm95_vm1, %vm674_vm2  ;;  %v174_v14 = vld [vmem:[#allocation6 + $0x20] sm:$0xff] }
  0x4c   :  { %504 = vmatpush3.bf16.msra.mxu0 %v503_v5  ;;  %v513_v13 = vpack.c.bf16 %v173_v10, %v172_v9  ;;  %v175_v15 = vld [vmem:[#allocation6 + $0x28] sm:$0xff]  ;;  %v79_v16 = vld [vmem:[#allocation2] sm:$0xff]  ;;  %v176_v18 = vld [vmem:[#allocation6 + $0x30] sm:$0xff]  ;;  %v357_v9 = vlaneseq }
  0x4d   :  { %505 = vmatprep.subr.bf16.mxu0 %v671_v0  ;;  %511 = vmatpush3.bf16.msra.mxu1 %v510_v12  ;;  %v516_v17 = vpack.c.bf16 %v175_v15, %v174_v14  ;;  %v177_v19 = vld [vmem:[#allocation6 + $0x38] sm:$0xff]  ;;  %v178_v21 = vld [vmem:[#allocation6 + $0x40] sm:$0xff]  ;;  %v179_v22 = vld [vmem:[#allocation6 + $0x48] sm:$0xff] }
  0x4e   :  { %512 = vmatprep.subr.bf16.mxu1 %v671_v0  ;;  %v519_v20 = vpack.c.bf16 %v177_v19, %v176_v18  ;;  %v522_v23 = vpack.c.bf16 %v179_v22, %v178_v21  ;;  %v180_v24 = vld [vmem:[#allocation6 + $0x50] sm:$0xff]  ;;  %v181_v25 = vld [vmem:[#allocation6 + $0x58] sm:$0xff]  ;;  %v182_v27 = vld [vmem:[#allocation6 + $0x60] sm:$0xff]  ;;  %v358_v10 = vand.u32 127, %v357_v9 }
  0x4f   :  { %v525_v26 = vpack.c.bf16 %v181_v25, %v180_v24  ;;  %v183_v28 = vld [vmem:[#allocation6 + $0x68] sm:$0xff]  ;;  %v184_v30 = vld [vmem:[#allocation6 + $0x70] sm:$0xff]  ;;  %v185_v31 = vld [vmem:[#allocation6 + $0x78] sm:$0xff] }
  0x50   :  { %508 = vmatpush3.bf16.msk.msra.mxu0 %vm507_vm3, %v506_v11  ;;  %v528_v29 = vpack.c.bf16 %v183_v28, %v182_v27  ;;  %v531_v32 = vpack.c.bf16 %v185_v31, %v184_v30  ;;  %v264_v33 = vld [vmem:[#allocation7] sm:$0xff]  ;;  %v265_v34 = vld [vmem:[#allocation7 + $0x8] sm:$0xff]  ;;  %v266_v35 = vld [vmem:[#allocation7 + $0x10] sm:$0xff]  ;;  %vm365_vm5 = vcmp.lt.s32.totalorder %v358_v10, 40  ;;  %vm364_vm6 = vcmp.lt.s32.totalorder %v358_v10, 20 }
  0x51   :  { %533 = vmatprep.subr.bf16.mxu0 %v671_v0  ;;  %514 = vmatpush3.bf16.msra.mxu1 %v513_v13  ;;  %v534_v36 = vpack.c.bf16 %v265_v34, %v264_v33  ;;  %v267_v37 = vld [vmem:[#allocation7 + $0x18] sm:$0xff]  ;;  %v268_v39 = vld [vmem:[#allocation7 + $0x20] sm:$0xff]  ;;  %v269_v40 = vld [vmem:[#allocation7 + $0x28] sm:$0xff] }
  0x52   :  { %515 = vmatprep.subr.bf16.mxu1 %v671_v0  ;;  %v537_v38 = vpack.c.bf16 %v267_v37, %v266_v35  ;;  %v540_v41 = vpack.c.bf16 %v269_v40, %v268_v39  ;;  %v270_v42 = vld [vmem:[#allocation7 + $0x30] sm:$0xff]  ;;  %v271_v43 = vld [vmem:[#allocation7 + $0x38] sm:$0xff]  ;;  %v272_v45 = vld [vmem:[#allocation7 + $0x40] sm:$0xff] }
  0x53   :  { %430 = vmatmul.mubr.msk.f32.vlgmr.msra.gmra.mrb[0].mxu0 %vm91_vm4, %v79_v16  ;;  %v543_v44 = vpack.c.bf16 %v271_v43, %v270_v42  ;;  %v273_v46 = vld [vmem:[#allocation7 + $0x48] sm:$0xff]  ;;  %v274_v48 = vld [vmem:[#allocation7 + $0x50] sm:$0xff]  ;;  %v275_v49 = vld [vmem:[#allocation7 + $0x58] sm:$0xff] }
  0x54   :  { %499 = vmatprep.mubr.msk.f32.mxu0 %vm672_vm0, %v673_v1  ;;  %535 = vmatpush3.bf16.msra.mxu0 %v534_v36  ;;  %v546_v47 = vpack.c.bf16 %v273_v46, %v272_v45  ;;  %v549_v50 = vpack.c.bf16 %v275_v49, %v274_v48  ;;  %v276_v51 = vld [vmem:[#allocation7 + $0x60] sm:$0xff]  ;;  %v277_v52 = vld [vmem:[#allocation7 + $0x68] sm:$0xff]  ;;  %v376_v54 = vld [vmem:[%s807_s2] ss:$0 sm:$0xff] }
  0x55   :  { %517 = vmatpush3.bf16.msra.mxu1 %v516_v17  ;;  %536 = vmatprep.subr.bf16.mxu0 %v671_v0  ;;  %v552_v53 = vpack.c.bf16 %v277_v52, %v276_v51  ;;  %v278_v59 = vld [vmem:[#allocation7 + $0x70] sm:$0xff]  ;;  %v279_v60 = vld [vmem:[#allocation7 + $0x78] sm:$0xff] }
  0x56   :  { %518 = vmatprep.subr.bf16.mxu1 %v671_v0  ;;  %v555_v61 = vpack.c.bf16 %v279_v60, %v278_v59  ;;  %v379_v62 = vld [vmem:[%s809_s4] ss:$0 sm:$0xff] }
  0x57   :  { %v380_v3 = vld [vmem:[%s811_s6] ss:$0 sm:$0xff] }
  0x58   :  { %538 = vmatpush3.bf16.msra.mxu0 %v537_v38 }
  0x59   :  { %520 = vmatpush3.bf16.msra.mxu1 %v519_v20  ;;  %539 = vmatprep.subr.bf16.mxu0 %v671_v0 }
  0x5a   :  { %521 = vmatprep.subr.bf16.mxu1 %v671_v0 }
  0x5c   :  { %541 = vmatpush3.bf16.msra.mxu0 %v540_v41 }
  0x5d   :  { %523 = vmatpush3.bf16.msra.mxu1 %v522_v23  ;;  %542 = vmatprep.subr.bf16.mxu0 %v671_v0 }
  0x5e   :  { %524 = vmatprep.subr.bf16.mxu1 %v671_v0 }
  0x60   :  { %544 = vmatpush3.bf16.msra.mxu0 %v543_v44 }
  0x61   :  { %526 = vmatpush3.bf16.msra.mxu1 %v525_v26  ;;  %545 = vmatprep.subr.bf16.mxu0 %v671_v0 }
  0x62   :  { %527 = vmatprep.subr.bf16.mxu1 %v671_v0 }
  0x64   :  { %547 = vmatpush3.bf16.msra.mxu0 %v546_v47 }
  0x65   :  { %529 = vmatpush3.bf16.msra.mxu1 %v528_v29  ;;  %548 = vmatprep.subr.bf16.mxu0 %v671_v0 }
  0x66   :  { %530 = vmatprep.subr.bf16.mxu1 %v671_v0 }
  0x68   :  { %550 = vmatpush3.bf16.msra.mxu0 %v549_v50 }
  0x69   :  { %532 = vmatpush3.bf16.msra.mxu1 %v531_v32  ;;  %551 = vmatprep.subr.bf16.mxu0 %v671_v0 }
  0x6c   :  { %553 = vmatpush3.bf16.msra.mxu0 %v552_v53 }
  0x6d   :  { %554 = vmatprep.subr.bf16.mxu0 %v671_v0 }
  0x70   :  { %556 = vmatpush3.bf16.msra.mxu0 %v555_v61 }
 0x126   :  { %v165_v55 = vpop.f32.mrb[0].mxu0 }
 0x127   :  { %v166_v56 = vadd.f32 %v376_v54, %v165_v55  ;;  %v431_v57 = vpop.f32.mrb[1].mxu0 }
 0x129   :  { %v169_v58 = vmax.f32 %v166_v56, 0.0 }
 0x12b   :  { %465 = vmatmul.mubr.f32.vlgmr.msra.gmra.mrb[0].mxu1 %v169_v58 }
 0x1fe   :  { %v259_v63 = vpop.f32.mrb[0].mxu1 }
 0x1ff   :  { %v260_v1 = vadd.f32 %v379_v62, %v259_v63  ;;  %v466_v0 = vpop.f32.mrb[1].mxu1 }
 0x201   :  { %v263_v2 = vmax.f32 %v260_v1, 0.0 }
 0x203   :  { %500 = vmatmul.mubr.f32.vlgmr.msra.gmra.mrb[2].mxu0 %v263_v2 }
 0x2d6   :  { %v353_v4 = vpop.f32.mrb[2].mxu0 }
 0x2d7   :  { %v354_v5 = vadd.f32 %v380_v3, %v353_v4  ;;  %v501_v6 = vpop.f32.mrb[3].mxu0 }
 0x2d9   :  { %567 = vtanh.f32 %v354_v5  ;;  %v381_v12 = vclamps-f32 %v354_v5, 5.0 }
 0x2e3   :  { %v568_v7 = vpop.eup %567 }
 0x2e4   :  { %v362_v8 = vmul.f32 1.442695, %v568_v7 }
 0x2e6   :  { %569 = vpow2.f32 %v362_v8 }
 0x2f0   :  { %v570_v11 = vpop.eup %569 }
 0x2f1   :  { %v366_v13 = vsel %vm365_vm5, %v570_v11, 0.0 }
 0x2f2   :  { %v367_v14 = vsel %vm364_vm6, %v381_v12, %v366_v13 }
 0x2f3   :  { %368 = vst [vmem:[%s812_s7] sm:$0xff] %v367_v14 }
 0x2f4   :  { %373 = vsyncpa [#allocation3], 1 }
 0x2f5   :  { %374 = vsyncpa [#allocation5], 1 }
 0x2f6   :  { %375 = vsyncpa [#allocation8], 1 }

</bundles_post_ra>
